<compile_context>
chip_gen: v6e
topology: v6e:2x2x1
jax: 0.10.0
libtpu: 0.0.40
codegen_flags: <defaults>
</compile_context>

<pallas_src>
import functools

import jax
import jax.numpy as jnp
from jax.experimental import pallas as pl
from jax.experimental.pallas import tpu as pltpu


# -----------------------------------------------------------------------------
# VMEM budgeting (generation-aware, with headroom)
# -----------------------------------------------------------------------------
def _vmem_limit_bytes():
    """Scoped VMEM limit with headroom: ~48 MiB on 64-MiB v7x parts,
    ~112 MiB on 128-MiB v5e/v6e parts."""
    cap = 64 * 1024 * 1024
    try:
        cap = int(pltpu.get_tpu_info().vmem_capacity_bytes)
    except Exception:
        pass
    return max(cap - 16 * 1024 * 1024, 32 * 1024 * 1024)


def _pick_feature_tile(d, n, budget_bytes):
    """Largest MXU-friendly feature tile whose per-step working set (streamed
    (N, td) blocks, double-buffered, plus the two (td, td) Gram results) fits
    `budget_bytes`."""
    if d % 128 != 0:
        return d                      # toy / odd feature dims: one full tile
    for cand in (1024, 512, 256, 128):
        if d % cand != 0:
            continue
        footprint = 28 * n * cand + 8 * cand * cand   # rough f32/bf16 mix
        if footprint <= budget_bytes:
            return cand
    # TODO(synk): stream the batch axis when even td=128 with the full batch
    # does not fit (very large N).
    return 128


# -----------------------------------------------------------------------------
# Pass 1: fused per-feature statistics + centered copies (one read of each tile)
# -----------------------------------------------------------------------------
def _stats_kernel(za_ref, zb_ref, ma_ref, mb_ref, inv_ref, ha_ref, hb_ref,
                  zca_ref, zcb_ref, *, n):
    za = za_ref[...]
    zb = zb_ref[...]

    # invariance partial: per-feature column sum of (z_a - z_b)^2
    diff = za - zb
    inv_ref[...] = jnp.sum(diff * diff, axis=0, keepdims=True)

    # column means (full batch resident in this block)
    inv_n = 1.0 / n
    mean_a = jnp.sum(za, axis=0, keepdims=True) * inv_n
    mean_b = jnp.sum(zb, axis=0, keepdims=True) * inv_n
    ma_ref[...] = mean_a
    mb_ref[...] = mean_b

    # centered copies in the covariance matmul dtype (bf16 by default)
    za_c = za - mean_a
    zb_c = zb - mean_b
    zca_ref[...] = za_c.astype(zca_ref.dtype)
    zcb_ref[...] = zb_c.astype(zcb_ref.dtype)

    # unbiased per-feature variance -> variance hinge partials
    inv_nm1 = 1.0 / (n - 1)
    var_a = jnp.sum(za_c * za_c, axis=0, keepdims=True) * inv_nm1
    var_b = jnp.sum(zb_c * zb_c, axis=0, keepdims=True) * inv_nm1
    ha_ref[...] = jnp.maximum(1.0 - jnp.sqrt(var_a + 1e-4), 0.0)
    hb_ref[...] = jnp.maximum(1.0 - jnp.sqrt(var_b + 1e-4), 0.0)


# -----------------------------------------------------------------------------
# Pass 2: ||cov - I||_F^2 for BOTH branches, upper-triangular feature blocks
# -----------------------------------------------------------------------------
def _cov_kernel(ii_ref, jj_ref, zai_ref, zaj_ref, zbi_ref, zbj_ref, out_ref,
                *, n):
    p = pl.program_id(0)
    i = ii_ref[p]
    j = jj_ref[p]
    is_diag = i == j

    dn = (((0,), (0,)), ((), ()))            # contract over the batch axis
    inv_nm1 = 1.0 / (n - 1)
    cov_a = jax.lax.dot_general(zai_ref[...], zaj_ref[...], dn,
                                preferred_element_type=jnp.float32) * inv_nm1
    cov_b = jax.lax.dot_general(zbi_ref[...], zbj_ref[...], dn,
                                preferred_element_type=jnp.float32) * inv_nm1

    td_i = cov_a.shape[0]
    td_j = cov_a.shape[1]
    row = jax.lax.broadcasted_iota(jnp.int32, (td_i, td_j), 0)
    col = jax.lax.broadcasted_iota(jnp.int32, (td_i, td_j), 1)
    eye = jnp.where(jnp.logical_and(row == col, is_diag), 1.0, 0.0)

    da = cov_a - eye
    db = cov_b - eye
    weight = jnp.where(is_diag, 1.0, 2.0)    # off-diagonal blocks counted twice
    part = weight * (jnp.sum(da * da) + jnp.sum(db * db))
    out_ref[...] = jnp.zeros((8, 128), jnp.float32) + part


# -----------------------------------------------------------------------------
# Optional pairwise-distance term (only compiled when pairdist_weight != 0)
# -----------------------------------------------------------------------------
def _row_sq_norms(x):
    return jnp.sum(x * x, axis=1, keepdims=True)


def _cdist_from_sq(x, y, x2, y2):
    xy = jax.lax.dot_general(x, y, (((1,), (1,)), ((), ())),
                             preferred_element_type=jnp.float32)
    return jnp.sqrt(jnp.maximum(x2 + y2.T - 2.0 * xy, 0.0))


def _pairdist_kernel(za_ref, zb_ref, ma_ref, mb_ref, out_ref):
    # TODO(synk): tile over (qi, kj) batch blocks for large N; this grid-less
    # form holds three N x N f32 buffers in VMEM (small-N only).
    za_c = za_ref[...] - ma_ref[...]
    zb_c = zb_ref[...] - mb_ref[...]
    a2 = _row_sq_norms(za_c)
    b2 = _row_sq_norms(zb_c)
    pd1 = _cdist_from_sq(za_c, za_c, a2, a2)   # self-cdist: reuse row norms
    pd2 = _cdist_from_sq(zb_c, zb_c, b2, b2)
    p1 = _row_sq_norms(pd1)
    p2 = _row_sq_norms(pd2)
    pd = _cdist_from_sq(pd1, pd2, p1, p2)
    out_ref[0, 0] = jnp.mean(pd)


# -----------------------------------------------------------------------------
# Wrapper
# -----------------------------------------------------------------------------
def vicreg_loss(z_a, z_b, lambda_var=25.0, mu=25.0, nu=1.0,
                pairdist_weight=0.0, feature_tile=None,
                cov_input_dtype=jnp.bfloat16):
    n, d = z_a.shape
    assert z_b.shape == (n, d)
    assert n >= 2, "VICReg needs batch size >= 2 (division by n - 1)"
    z_a = z_a.astype(jnp.float32)
    z_b = z_b.astype(jnp.float32)

    vmem_limit = _vmem_limit_bytes()
    if feature_tile is not None:
        td = feature_tile
    else:
        td = _pick_feature_tile(d, n, budget_bytes=int(vmem_limit * 0.75))
    assert d % td == 0, (d, td)
    n_tiles = d // td

    # ---- Pass 1: per-feature stats + centered (cov-dtype) copies -----------
    stats_out = pl.pallas_call(
        functools.partial(_stats_kernel, n=n),
        grid=(n_tiles,),
        in_specs=[pl.BlockSpec((n, td), lambda j: (0, j)),
                  pl.BlockSpec((n, td), lambda j: (0, j))],
        out_specs=[pl.BlockSpec((1, td), lambda j: (0, j))] * 5 +
                  [pl.BlockSpec((n, td), lambda j: (0, j))] * 2,
        out_shape=[jax.ShapeDtypeStruct((1, d), jnp.float32)] * 5 +
                  [jax.ShapeDtypeStruct((n, d), cov_input_dtype)] * 2,
        compiler_params=pltpu.CompilerParams(
            dimension_semantics=("parallel",),
            vmem_limit_bytes=vmem_limit),
    )(z_a, z_b)
    mean_a, mean_b, inv_colsum, hinge_a, hinge_b, zc_a, zc_b = stats_out

    inv_loss = jnp.sum(inv_colsum) / (n * d)
    var_loss = jnp.mean(hinge_a) + jnp.mean(hinge_b)

    # ---- Pass 2: fused ||cov_a - I||^2 + ||cov_b - I||^2 (triangular grid) --
    iu, ju = [], []
    for i in range(n_tiles):
        for j in range(i, n_tiles):
            iu.append(i)
            ju.append(j)
    num_pairs = len(iu)
    ii = jnp.asarray(iu, dtype=jnp.int32)
    jj = jnp.asarray(ju, dtype=jnp.int32)

    zi_map = lambda p, ii, jj: (0, ii[p])
    zj_map = lambda p, ii, jj: (0, jj[p])

    cov_partials = pl.pallas_call(
        functools.partial(_cov_kernel, n=n),
        grid_spec=pltpu.PrefetchScalarGridSpec(
            num_scalar_prefetch=2,
            grid=(num_pairs,),
            in_specs=[pl.BlockSpec((n, td), zi_map),   # zc_a tile i
                      pl.BlockSpec((n, td), zj_map),   # zc_a tile j
                      pl.BlockSpec((n, td), zi_map),   # zc_b tile i
                      pl.BlockSpec((n, td), zj_map)],  # zc_b tile j
            out_specs=pl.BlockSpec((8, 128), lambda p, ii, jj: (p, 0))),
        out_shape=jax.ShapeDtypeStruct((num_pairs * 8, 128), jnp.float32),
        compiler_params=pltpu.CompilerParams(
            dimension_semantics=("parallel",),
            vmem_limit_bytes=vmem_limit),
    )(ii, jj, zc_a, zc_a, zc_b, zc_b)

    cov_loss = jnp.sum(cov_partials[::8, 0]) / d

    loss = lambda_var * inv_loss + mu * var_loss + nu * cov_loss

    if pairdist_weight != 0.0:  # static Python branch: skipped by default
        pd = pl.pallas_call(
            _pairdist_kernel,
            out_shape=jax.ShapeDtypeStruct((1, 1), jnp.float32),
            in_specs=[pl.BlockSpec(memory_space=pltpu.MemorySpace.VMEM)] * 4,
            out_specs=pl.BlockSpec(memory_space=pltpu.MemorySpace.SMEM),
            compiler_params=pltpu.CompilerParams(vmem_limit_bytes=vmem_limit),
        )(z_a, z_b, mean_a, mean_b)
        loss = loss + pairdist_weight * pd[0, 0]

    return loss


# -----------------------------------------------------------------------------
# Pure-JAX reference (mirrors the PyTorch module exactly)
# -----------------------------------------------------------------------------
def _reference(z_a, z_b, lambda_var=25.0, mu=25.0, nu=1.0, pairdist_weight=0.0):
    n, d = z_a.shape
    inv = jnp.mean((z_a - z_b) ** 2)
    za = z_a - z_a.mean(axis=0)
    zb = z_b - z_b.mean(axis=0)
    std_a = jnp.sqrt(jnp.var(za, axis=0, ddof=1) + 1e-4)
    std_b = jnp.sqrt(jnp.var(zb, axis=0, ddof=1) + 1e-4)
    var = (jnp.mean(jnp.maximum(1.0 - std_a, 0.0))
           + jnp.mean(jnp.maximum(1.0 - std_b, 0.0)))
    cov_a = za.T @ za / (n - 1)
    cov_b = zb.T @ zb / (n - 1)
    eye = jnp.eye(d)
    cov = jnp.sum((cov_a - eye) ** 2) / d + jnp.sum((cov_b - eye) ** 2) / d

    def cdist(x, y):
        sq = (jnp.sum(x * x, 1)[:, None] + jnp.sum(y * y, 1)[None, :]
              - 2.0 * x @ y.T)
        return jnp.sqrt(jnp.maximum(sq, 0.0))

    pd = cdist(cdist(za, za), cdist(zb, zb)).mean()
    return lambda_var * inv + mu * var + nu * cov + pairdist_weight * pd


if __name__ == "__main__":
    key = jax.random.PRNGKey(0)
    k1, k2 = jax.random.split(key)
    N, D = 16, 256
    z_a = jax.random.normal(k1, (N, D), dtype=jnp.float32)
    z_b = jax.random.normal(k2, (N, D), dtype=jnp.float32)

    ref0 = _reference(z_a, z_b)

    # Default config: bf16 MXU inputs, auto tile, pairdist statically skipped.
    loss0 = vicreg_loss(z_a, z_b)
    jax.block_until_ready(loss0)
    assert jnp.allclose(loss0, ref0, rtol=5e-3, atol=5e-3), (loss0, ref0)

    # f32 covariance path + multi-tile triangular grid (2x2 -> 3 pairs).
    loss1 = vicreg_loss(z_a, z_b, feature_tile=128,
                        cov_input_dtype=jnp.float32)
    jax.block_until_ready(loss1)
    assert jnp.allclose(loss1, ref0, rtol=1e-3, atol=1e-3), (loss1, ref0)

    # Pairwise-distance branch enabled.
    loss2 = vicreg_loss(z_a, z_b, pairdist_weight=0.5, feature_tile=128,
                        cov_input_dtype=jnp.float32)
    jax.block_until_ready(loss2)
    ref2 = _reference(z_a, z_b, pairdist_weight=0.5)
    assert jnp.allclose(loss2, ref2, rtol=1e-3, atol=1e-3), (loss2, ref2)

    print("KERNEL_OK")
</pallas_src>

<mosaic_0001>
module attributes {stable_mosaic.version = 11 : i64} {
  func.func @_stats_kernel(%arg0: i32, %arg1: memref<16x256xf32, #tpu.memory_space<vmem>>, %arg2: memref<16x256xf32, #tpu.memory_space<vmem>>, %arg3: memref<1x256xf32, #tpu.memory_space<vmem>>, %arg4: memref<1x256xf32, #tpu.memory_space<vmem>>, %arg5: memref<1x256xf32, #tpu.memory_space<vmem>>, %arg6: memref<1x256xf32, #tpu.memory_space<vmem>>, %arg7: memref<1x256xf32, #tpu.memory_space<vmem>>, %arg8: memref<16x256xbf16, #tpu.memory_space<vmem>>, %arg9: memref<16x256xbf16, #tpu.memory_space<vmem>>) attributes {dimension_semantics = [#tpu.dimension_semantics<parallel>], iteration_bounds = array<i64: 1>, scalar_prefetch = 0 : i64, scratch_operands = 0 : i64, tpu.core_type = #tpu.core_type<tc>, window_params = [{transform_indices = @transform_0, window_bounds = array<i64: 16, 256>}, {transform_indices = @transform_1, window_bounds = array<i64: 16, 256>}, {transform_indices = @transform_2, window_bounds = array<i64: 1, 256>}, {transform_indices = @transform_3, window_bounds = array<i64: 1, 256>}, {transform_indices = @transform_4, window_bounds = array<i64: 1, 256>}, {transform_indices = @transform_5, window_bounds = array<i64: 1, 256>}, {transform_indices = @transform_6, window_bounds = array<i64: 1, 256>}, {transform_indices = @transform_7, window_bounds = array<i64: 16, 256>}, {transform_indices = @transform_8, window_bounds = array<i64: 16, 256>}]} {
    %c0 = arith.constant 0 : index
    %c0_0 = arith.constant 0 : index
    %0 = vector.load %arg1[%c0, %c0_0] : memref<16x256xf32, #tpu.memory_space<vmem>>, vector<16x256xf32>
    %c0_1 = arith.constant 0 : index
    %c0_2 = arith.constant 0 : index
    %1 = vector.load %arg2[%c0_1, %c0_2] : memref<16x256xf32, #tpu.memory_space<vmem>>, vector<16x256xf32>
    %2 = arith.subf %0, %1 : vector<16x256xf32>
    %3 = arith.mulf %2, %2 : vector<16x256xf32>
    %cst = arith.constant dense<0.000000e+00> : vector<256xf32>
    %4 = vector.multi_reduction <add>, %3, %cst [0] : vector<16x256xf32> to vector<256xf32>
    %5 = vector.shape_cast %4 : vector<256xf32> to vector<1x256xf32>
    %c0_3 = arith.constant 0 : index
    %c0_4 = arith.constant 0 : index
    %6 = vector.load %arg5[%c0_3, %c0_4] : memref<1x256xf32, #tpu.memory_space<vmem>>, vector<1x256xf32>
    tpu.vector_store %arg5[%c0_3, %c0_4], %5 {strides = array<i32>} : memref<1x256xf32, #tpu.memory_space<vmem>>, vector<1x256xf32>,
    %cst_5 = arith.constant dense<0.000000e+00> : vector<256xf32>
    %7 = vector.multi_reduction <add>, %0, %cst_5 [0] : vector<16x256xf32> to vector<256xf32>
    %8 = vector.shape_cast %7 : vector<256xf32> to vector<1x256xf32>
    %cst_6 = arith.constant 6.250000e-02 : f32
    %9 = vector.broadcast %cst_6 : f32 to vector<1x256xf32>
    %10 = arith.mulf %8, %9 : vector<1x256xf32>
    %cst_7 = arith.constant dense<0.000000e+00> : vector<256xf32>
    %11 = vector.multi_reduction <add>, %1, %cst_7 [0] : vector<16x256xf32> to vector<256xf32>
    %12 = vector.shape_cast %11 : vector<256xf32> to vector<1x256xf32>
    %cst_8 = arith.constant 6.250000e-02 : f32
    %13 = vector.broadcast %cst_8 : f32 to vector<1x256xf32>
    %14 = arith.mulf %12, %13 : vector<1x256xf32>
    %c0_9 = arith.constant 0 : index
    %c0_10 = arith.constant 0 : index
    %15 = vector.load %arg3[%c0_9, %c0_10] : memref<1x256xf32, #tpu.memory_space<vmem>>, vector<1x256xf32>
    tpu.vector_store %arg3[%c0_9, %c0_10], %10 {strides = array<i32>} : memref<1x256xf32, #tpu.memory_space<vmem>>, vector<1x256xf32>,
    %c0_11 = arith.constant 0 : index
    %c0_12 = arith.constant 0 : index
    %16 = vector.load %arg4[%c0_11, %c0_12] : memref<1x256xf32, #tpu.memory_space<vmem>>, vector<1x256xf32>
    tpu.vector_store %arg4[%c0_11, %c0_12], %14 {strides = array<i32>} : memref<1x256xf32, #tpu.memory_space<vmem>>, vector<1x256xf32>,
    %17 = vector.broadcast %10 : vector<1x256xf32> to vector<16x256xf32>
    %18 = arith.subf %0, %17 : vector<16x256xf32>
    %19 = vector.broadcast %14 : vector<1x256xf32> to vector<16x256xf32>
    %20 = arith.subf %1, %19 : vector<16x256xf32>
    %21 = arith.truncf %18 : vector<16x256xf32> to vector<16x256xbf16>
    %c0_13 = arith.constant 0 : index
    %c0_14 = arith.constant 0 : index
    %22 = vector.load %arg8[%c0_13, %c0_14] : memref<16x256xbf16, #tpu.memory_space<vmem>>, vector<16x256xbf16>
    tpu.vector_store %arg8[%c0_13, %c0_14], %21 {strides = array<i32>} : memref<16x256xbf16, #tpu.memory_space<vmem>>, vector<16x256xbf16>,
    %23 = arith.truncf %20 : vector<16x256xf32> to vector<16x256xbf16>
    %c0_15 = arith.constant 0 : index
    %c0_16 = arith.constant 0 : index
    %24 = vector.load %arg9[%c0_15, %c0_16] : memref<16x256xbf16, #tpu.memory_space<vmem>>, vector<16x256xbf16>
    tpu.vector_store %arg9[%c0_15, %c0_16], %23 {strides = array<i32>} : memref<16x256xbf16, #tpu.memory_space<vmem>>, vector<16x256xbf16>,
    %25 = arith.mulf %18, %18 : vector<16x256xf32>
    %cst_17 = arith.constant dense<0.000000e+00> : vector<256xf32>
    %26 = vector.multi_reduction <add>, %25, %cst_17 [0] : vector<16x256xf32> to vector<256xf32>
    %27 = vector.shape_cast %26 : vector<256xf32> to vector<1x256xf32>
    %cst_18 = arith.constant 0.0666666701 : f32
    %28 = vector.broadcast %cst_18 : f32 to vector<1x256xf32>
    %29 = arith.mulf %27, %28 : vector<1x256xf32>
    %30 = arith.mulf %20, %20 : vector<16x256xf32>
    %cst_19 = arith.constant dense<0.000000e+00> : vector<256xf32>
    %31 = vector.multi_reduction <add>, %30, %cst_19 [0] : vector<16x256xf32> to vector<256xf32>
    %32 = vector.shape_cast %31 : vector<256xf32> to vector<1x256xf32>
    %cst_20 = arith.constant 0.0666666701 : f32
    %33 = vector.broadcast %cst_20 : f32 to vector<1x256xf32>
    %34 = arith.mulf %32, %33 : vector<1x256xf32>
    %cst_21 = arith.constant 9.99999974E-5 : f32
    %35 = vector.broadcast %cst_21 : f32 to vector<1x256xf32>
    %36 = arith.addf %29, %35 : vector<1x256xf32>
    %37 = math.sqrt %36 : vector<1x256xf32>
    %cst_22 = arith.constant 1.000000e+00 : f32
    %38 = vector.broadcast %cst_22 : f32 to vector<1x256xf32>
    %39 = arith.subf %38, %37 : vector<1x256xf32>
    %cst_23 = arith.constant 0.000000e+00 : f32
    %40 = vector.broadcast %cst_23 : f32 to vector<1x256xf32>
    %41 = arith.maximumf %39, %40 : vector<1x256xf32>
    %c0_24 = arith.constant 0 : index
    %c0_25 = arith.constant 0 : index
    %42 = vector.load %arg6[%c0_24, %c0_25] : memref<1x256xf32, #tpu.memory_space<vmem>>, vector<1x256xf32>
    tpu.vector_store %arg6[%c0_24, %c0_25], %41 {strides = array<i32>} : memref<1x256xf32, #tpu.memory_space<vmem>>, vector<1x256xf32>,
    %cst_26 = arith.constant 9.99999974E-5 : f32
    %43 = vector.broadcast %cst_26 : f32 to vector<1x256xf32>
    %44 = arith.addf %34, %43 : vector<1x256xf32>
    %45 = math.sqrt %44 : vector<1x256xf32>
    %cst_27 = arith.constant 1.000000e+00 : f32
    %46 = vector.broadcast %cst_27 : f32 to vector<1x256xf32>
    %47 = arith.subf %46, %45 : vector<1x256xf32>
    %cst_28 = arith.constant 0.000000e+00 : f32
    %48 = vector.broadcast %cst_28 : f32 to vector<1x256xf32>
    %49 = arith.maximumf %47, %48 : vector<1x256xf32>
    %c0_29 = arith.constant 0 : index
    %c0_30 = arith.constant 0 : index
    %50 = vector.load %arg7[%c0_29, %c0_30] : memref<1x256xf32, #tpu.memory_space<vmem>>, vector<1x256xf32>
    tpu.vector_store %arg7[%c0_29, %c0_30], %49 {strides = array<i32>} : memref<1x256xf32, #tpu.memory_space<vmem>>, vector<1x256xf32>,
    return
  }
  func.func @transform_0(%arg0: i32) -> (i32, i32) {
    %c0_i32 = arith.constant 0 : i32
    %c0_i32_0 = arith.constant 0 : i32
    return %c0_i32, %arg0 : i32, i32
  }
  func.func @transform_1(%arg0: i32) -> (i32, i32) {
    %c0_i32 = arith.constant 0 : i32
    %c0_i32_0 = arith.constant 0 : i32
    return %c0_i32, %arg0 : i32, i32
  }
  func.func @transform_2(%arg0: i32) -> (i32, i32) {
    %c0_i32 = arith.constant 0 : i32
    %c0_i32_0 = arith.constant 0 : i32
    return %c0_i32, %arg0 : i32, i32
  }
  func.func @transform_3(%arg0: i32) -> (i32, i32) {
    %c0_i32 = arith.constant 0 : i32
    %c0_i32_0 = arith.constant 0 : i32
    return %c0_i32, %arg0 : i32, i32
  }
  func.func @transform_4(%arg0: i32) -> (i32, i32) {
    %c0_i32 = arith.constant 0 : i32
    %c0_i32_0 = arith.constant 0 : i32
    return %c0_i32, %arg0 : i32, i32
  }
  func.func @transform_5(%arg0: i32) -> (i32, i32) {
    %c0_i32 = arith.constant 0 : i32
    %c0_i32_0 = arith.constant 0 : i32
    return %c0_i32, %arg0 : i32, i32
  }
  func.func @transform_6(%arg0: i32) -> (i32, i32) {
    %c0_i32 = arith.constant 0 : i32
    %c0_i32_0 = arith.constant 0 : i32
    return %c0_i32, %arg0 : i32, i32
  }
  func.func @transform_7(%arg0: i32) -> (i32, i32) {
    %c0_i32 = arith.constant 0 : i32
    %c0_i32_0 = arith.constant 0 : i32
    return %c0_i32, %arg0 : i32, i32
  }
  func.func @transform_8(%arg0: i32) -> (i32, i32) {
    %c0_i32 = arith.constant 0 : i32
    %c0_i32_0 = arith.constant 0 : i32
    return %c0_i32, %arg0 : i32, i32
  }
}

</mosaic_0001>

<bundles_post_ra>
// kernel: tpu_custom_call.1
= control target key start
LH: loop header
LB: loop body
LE: loop exit
PB: predicated region body
PF: predicated region fallthrough
CT: control target
= control target key end

     0   :  { %14 = vsyncpa [#allocation3], 0  ;;  %s851_s0 = inlined_call_operand.hbm [shape: f32[16,256], index: 0, kind: input, shape index: {}]   ;;  %s852_s1 = inlined_call_operand.hbm [shape: f32[16,256], index: 1, kind: input, shape index: {}]   ;;  %s853_s2 = inlined_call_operand.hbm [shape: f32[1,256], index: 2, kind: output, shape index: {0}]   ;;  %s854_s3 = inlined_call_operand.hbm [shape: f32[1,256], index: 3, kind: output, shape index: {1}]   ;;  %s855_s4 = inlined_call_operand.hbm [shape: f32[1,256], index: 4, kind: output, shape index: {2}]   ;;  %s856_s5 = inlined_call_operand.hbm [shape: f32[1,256], index: 5, kind: output, shape index: {3}]   ;;  %s857_s6 = inlined_call_operand.hbm [shape: f32[1,256], index: 6, kind: output, shape index: {4}]   ;;  %s858_s7 = inlined_call_operand.hbm [shape: bf16[16,256], index: 7, kind: output, shape index: {5}]   ;;  %s859_s8 = inlined_call_operand.hbm [shape: bf16[16,256], index: 8, kind: output, shape index: {6}]  }
   0x1   :  { %15 = vsyncpa [#allocation6], 0 }
   0x2   :  { %16 = vsyncpa [#allocation4], 0 }
   0x3   :  { %17 = vsyncpa [#allocation9], 0 }
   0x4   :  { %18 = vsyncpa [#allocation12], 0 }
   0x5   :  { %19 = vsyncpa [#allocation15], 0  ;;  %s650_s27 = smov [#allocation2]  }
   0x6   :  { %s25_s28 = sshll.u32 %s650_s27, 4  ;;  %s26_s28 = int_to_ptr.vmem [resolvable:$true] %s25_s28 }
   0x7   :  { %s466_s29 = scalar_lea.vmem %s26_s28, 512  ;;  %p471_p1 = scmp.lt.s32.totalorder %s26_s28, %s26_s28 }
   0x8   :  { %p467_p0 = scmp.ne.s32.totalorder %s26_s28, %s466_s29  ;;  %p472_p2 = scmp.lt.s32.totalorder %s466_s29, %s466_s29 }
   0xa   :  { %p473_p3 = por %p472_p2, %p471_p1 }
   0xc   :  { %p474_p4 = pnand %p473_p3, %p467_p0 }
   0xe   :  { %477 = shalt.err (!%p474_p4)
}
   0xf   :  { %s651_s30 = smov 256   ;;  %s652_s9 = smov 16  }
  0x10   :  { %31 = dma.hbm_to_vmem [thread:$0]  %s851_s0, 512, %s26_s28, [#allocation3], %s651_s30, %s651_s30, %s652_s9  }
  0x11   :  { %s653_s12 = smov [#allocation5]  }
  0x12   :  { %s37_s13 = sshll.u32 %s653_s12, 4  ;;  %s38_s13 = int_to_ptr.vmem [resolvable:$true] %s37_s13 }
  0x13   :  { %s486_s14 = scalar_lea.vmem %s38_s13, 512  ;;  %p491_p6 = scmp.lt.s32.totalorder %s38_s13, %s38_s13 }
  0x14   :  { %p487_p5 = scmp.ne.s32.totalorder %s38_s13, %s486_s14  ;;  %p492_p7 = scmp.lt.s32.totalorder %s486_s14, %s486_s14 }
  0x16   :  { %p493_p8 = por %p492_p7, %p491_p6 }
  0x18   :  { %p494_p9 = pnand %p493_p8, %p487_p5 }
  0x1a   :  { %497 = shalt.err (!%p494_p9)
}
  0x1b   :  { %43 = dma.hbm_to_vmem [thread:$0]  %s852_s1, 512, %s38_s13, [#allocation6], %s651_s30, %s651_s30, %s652_s9  }
  0x1c   :  { %638 = dma.done.wait [#allocation3], 512  }
  0x1d   :  { %639 = vsyncadd [#allocation3], 4294966784 }
  0x1e   :  { %640 = dma.done.wait [#allocation6], 512  }
  0x1f   :  { %641 = vsyncadd [#allocation6], 4294966784  ;;  %v715_v0 = vld [vmem:[#allocation5] sm:$0xff]  ;;  %v717_v1 = vld [vmem:[#allocation5 + $0x8] sm:$0xff]  ;;  %v654_v30 = vmov 1966171168   ;;  %v86_v32 = vlaneseq }
  0x20   :  { %v719_v2 = vld [vmem:[#allocation5 + $0x10] sm:$0xff]  ;;  %v721_v3 = vld [vmem:[#allocation5 + $0x18] sm:$0xff]  ;;  %v725_v5 = vld [vmem:[#allocation2] sm:$0xff]  ;;  %v84_v31 = vunpack.c.l.s4 %v654_v30  ;;  %s655_s0 = smov [#allocation8]   ;;  %s656_s17 = smov [#allocation14]  }
  0x21   :  { %v119_v4 = vadd.f32 %v719_v2, %v715_v0  ;;  %v727_v6 = vld [vmem:[#allocation2 + $0x8] sm:$0xff]  ;;  %v126_v7 = vadd.f32 %v721_v3, %v717_v1  ;;  %v731_v8 = vld [vmem:[#allocation2 + $0x10] sm:$0xff]  ;;  %v733_v9 = vld [vmem:[#allocation2 + $0x18] sm:$0xff]  ;;  %v58_v10 = vsub.f32 %v725_v5, %v715_v0  ;;  %v87_v46 = vshrl.u32 %v86_v32, 7  ;;  %s343_s1 = sshll.u32 %s655_s0, 4  ;;  %s382_s18 = sshll.u32 %s656_s17, 4  ;;  %s760_s1 = int_to_ptr.vmem [resolvable:$true] %s343_s1  ;;  %s768_s18 = int_to_ptr.vmem [resolvable:$true] %s382_s18 }
  0x22   :  { %v59_v11 = vsub.f32 %v727_v6, %v717_v1  ;;  %v60_v13 = vsub.f32 %v731_v8, %v719_v2  ;;  %v61_v14 = vsub.f32 %v733_v9, %v721_v3  ;;  %v103_v15 = vadd.f32 %v731_v8, %v725_v5  ;;  %s657_s19 = smov [#allocation7]   ;;  %s658_s21 = smov [#allocation10]  }
  0x23   :  { %v120_v12 = vrot.slane %v119_v4, 4  ;;  %v127_v16 = vrot.slane %v126_v7, 4  ;;  %v62_v17 = vmul.f32 %v58_v10, %v58_v10  ;;  %v110_v19 = vadd.f32 %v733_v9, %v727_v6  ;;  %s333_s20 = sshll.u32 %s657_s19, 4  ;;  %s353_s22 = sshll.u32 %s658_s21, 4  ;;  %s770_s20 = int_to_ptr.vmem [resolvable:$true] %s333_s20  ;;  %s777_s22 = int_to_ptr.vmem [resolvable:$true] %s353_s22 }
  0x24   :  { %v63_v18 = vmul.f32 %v59_v11, %v59_v11  ;;  %v64_v21 = vmul.f32 %v60_v13, %v60_v13  ;;  %v65_v22 = vmul.f32 %v61_v14, %v61_v14  ;;  %v104_v23 = vrot.slane %v103_v15, 4  ;;  %s659_s23 = smov [#allocation16]   ;;  %s498_s25 = scalar_lea.vmem %s760_s1, 32 }
  0x25   :  { %v121_v20 = vadd.f32 %v120_v12, %v119_v4  ;;  %v128_v24 = vadd.f32 %v127_v16, %v126_v7  ;;  %v111_v25 = vrot.slane %v110_v19, 4  ;;  %v85_v45 = vunpack.c.0.s8 %v84_v31  ;;  %s779_s24 = sshll.u32 %s659_s23, 4  ;;  %p499_p10 = scmp.ne.s32.totalorder %s760_s1, %s498_s25  ;;  %s808_s24 = int_to_ptr.vmem [resolvable:$true] %s779_s24 }
  0x26   :  { %v66_v27 = vadd.f32 %v64_v21, %v62_v17  ;;  %v73_v28 = vadd.f32 %v65_v22, %v63_v18  ;;  %v105_v29 = vadd.f32 %v104_v23, %v103_v15  ;;  %vm749_vm0 = vcmp.lt.s32.totalorder %v86_v32, 256  ;;  %p503_p11 = scmp.lt.s32.totalorder %s760_s1, %s760_s1  ;;  %p504_p12 = scmp.lt.s32.totalorder %s498_s25, %s498_s25 }
  0x27   :  { %v122_v26 = vrot.slane %v121_v20, 2  ;;  %v129_v33 = vrot.slane %v128_v24, 2  ;;  %v112_v34 = vadd.f32 %v111_v25, %v110_v19  ;;  %v747_v59 = vsub.s32 %v85_v45, %v87_v46 }
  0x28   :  { %v67_v36 = vrot.slane %v66_v27, 4  ;;  %v74_v37 = vrot.slane %v73_v28, 4  ;;  %v106_v38 = vrot.slane %v105_v29, 2  ;;  %p505_p13 = por %p504_p12, %p503_p11 }
  0x29   :  { %v123_v35 = vadd.f32 %v122_v26, %v121_v20  ;;  %v130_v39 = vadd.f32 %v129_v33, %v128_v24  ;;  %v113_v40 = vrot.slane %v112_v34, 2 }
  0x2a   :  { %v68_v42 = vadd.f32 %v67_v36, %v66_v27  ;;  %v75_v43 = vadd.f32 %v74_v37, %v73_v28  ;;  %v107_v44 = vadd.f32 %v106_v38, %v105_v29  ;;  %p506_p0 = pnand %p505_p13, %p499_p10 }
  0x2b   :  { %v124_v41 = vrot.slane %v123_v35, 1  ;;  %v131_v47 = vrot.slane %v130_v39, 1  ;;  %v114_v48 = vadd.f32 %v113_v40, %v112_v34 }
  0x2c   :  { %v108_v50 = vrot.slane %v107_v44, 1  ;;  %v69_v51 = vrot.slane %v68_v42, 2  ;;  %v76_v52 = vrot.slane %v75_v43, 2 }
  0x2d   :  { %v125_v49 = vadd.f32 %v124_v41, %v123_v35  ;;  %v132_v53 = vadd.f32 %v131_v47, %v130_v39  ;;  %v115_v54 = vrot.slane %v114_v48, 1 }
  0x2e   :  { %v109_v56 = vadd.f32 %v108_v50, %v107_v44  ;;  %v70_v57 = vadd.f32 %v69_v51, %v68_v42  ;;  %v77_v58 = vadd.f32 %v76_v52, %v75_v43 }
  0x2f   :  { %v133_v55 = vmul.f32 0.0625, %v125_v49  ;;  %v134_v61 = vmul.f32 0.0625, %v132_v53  ;;  %v116_v62 = vadd.f32 %v115_v54, %v114_v48 }
  0x30   :  { %v117_v63 = vmul.f32 0.0625, %v109_v56  ;;  %v71_v4 = vrot.slane %v70_v57, 1  ;;  %v78_v7 = vrot.slane %v77_v58, 1 }
  0x31   :  { %v177_v10 = vsub.f32 %v715_v0, %v133_v55  ;;  %v156_v11 = vcombine.low %v133_v55, %v134_v61  ;;  %v118_v12 = vmul.f32 0.0625, %v116_v62  ;;  %v178_v13 = vsub.f32 %v717_v1, %v134_v61 }
  0x32   :  { %v756_v14 = vsub.f32 %v719_v2, %v133_v55  ;;  %v173_v15 = vsub.f32 %v725_v5, %v117_v63  ;;  %v175_v16 = vsub.f32 %v731_v8, %v117_v63  ;;  %v72_v17 = vadd.f32 %v71_v4, %v70_v57 }
  0x33   :  { %v79_v18 = vadd.f32 %v78_v7, %v77_v58  ;;  %v163_v19 = vrot.slane %v156_v11, %v747_v59  ;;  %v174_v20 = vsub.f32 %v727_v6, %v118_v12  ;;  %v176_v0 = vsub.f32 %v733_v9, %v118_v12 }
  0x34   :  { %v137_v21 = vcombine.low %v117_v63, %v118_v12  ;;  %v209_v1 = vmul.f32 %v173_v15, %v173_v15  ;;  %v211_v2 = vmul.f32 %v175_v16, %v175_v16  ;;  %v434_v22 = vpack.c.bf16 %v178_v13, %v177_v10 }
  0x35   :  { %v82_v5 = vcombine.low %v72_v17, %v79_v18  ;;  %v170_v8 = vrot.slane %v163_v19, %v747_v59  ;;  %v432_v23 = vpack.c.bf16 %v174_v20, %v173_v15  ;;  %v210_v24 = vmul.f32 %v174_v20, %v174_v20 }
  0x36   :  { %v433_v25 = vpack.c.bf16 %v176_v0, %v175_v16  ;;  %v212_v26 = vmul.f32 %v176_v0, %v176_v0  ;;  %v213_v6 = vadd.f32 %v211_v2, %v209_v1  ;;  %v144_v27 = vrot.slane %v137_v21, %v747_v59  ;;  %207 = vst [vmem:[#allocation16] sm:$0xff] %v434_v22 }
  0x37   :  { %v89_v9 = vrot.slane %v82_v5, %v747_v59  ;;  %172 = vst.msk [vmem:[#allocation8] sm:$0x3] %vm749_vm0, %v170_v8  ;;  %193 = vst [vmem:[#allocation14] sm:$0xff] %v432_v23  ;;  %v229_v28 = vmul.f32 %v177_v10, %v177_v10  ;;  %v230_v29 = vmul.f32 %v178_v13, %v178_v13 }
  0x38   :  { %194 = vst [vmem:[#allocation14 + $0x8] sm:$0xff] %v433_v25  ;;  %v180_v30 = vsub.f32 %v721_v3, %v134_v61  ;;  %v231_v31 = vmul.f32 %v756_v14, %v756_v14  ;;  %v214_v32 = vrot.slane %v213_v6, 4  ;;  %v220_v33 = vadd.f32 %v212_v26, %v210_v24 }
  0x39   :  { %v96_v34 = vrot.slane %v89_v9, %v747_v59  ;;  %v151_v35 = vrot.slane %v144_v27, %v747_v59 }
  0x3a   :  { %509 = shalt.err (!%p506_p0)
}
  0x3b   :  { %346 = dma.vmem_to_hbm [thread:$0]  %s760_s1, 32, %s854_s3, [#allocation9]   ;;  %v435_v3 = vpack.c.bf16 %v180_v30, %v756_v14  ;;  %v232_v36 = vmul.f32 %v180_v30, %v180_v30  ;;  %v233_v37 = vadd.f32 %v231_v31, %v229_v28 }
  0x3c   :  { %s518_s28 = scalar_lea.vmem %s768_s18, 256  ;;  %p523_p2 = scmp.lt.s32.totalorder %s768_s18, %s768_s18 }
  0x3d   :  { %p519_p1 = scmp.ne.s32.totalorder %s768_s18, %s518_s28  ;;  %p524_p3 = scmp.lt.s32.totalorder %s518_s28, %s518_s28 }
  0x3f   :  { %p525_p4 = por %p524_p3, %p523_p2 }
  0x41   :  { %p526_p5 = pnand %p525_p4, %p519_p1 }
  0x43   :  { %529 = shalt.err (!%p526_p5)
}
  0x44   :  { %s660_s29 = smov 128   ;;  %s661_s30 = smov 8   ;;  %v215_v38 = vadd.f32 %v214_v32, %v213_v6  ;;  %v221_v39 = vrot.slane %v220_v33, 4  ;;  %102 = vst.msk [vmem:[#allocation10] sm:$0x3] %vm749_vm0, %v96_v34  ;;  %208 = vst [vmem:[#allocation16 + $0x8] sm:$0xff] %v435_v3  ;;  %v240_v41 = vadd.f32 %v232_v36, %v230_v29 }
  0x45   :  { %388 = dma.vmem_to_hbm [thread:$0]  %s768_s18, 256, %s858_s7, [#allocation15], %s660_s29, %s660_s29, %s661_s30   ;;  %153 = vst.msk [vmem:[#allocation7] sm:$0x3] %vm749_vm0, %v151_v35  ;;  %v234_v40 = vrot.slane %v233_v37, 4 }
  0x46   :  { %s538_s10 = scalar_lea.vmem %s770_s20, 32  ;;  %p543_p7 = scmp.lt.s32.totalorder %s770_s20, %s770_s20 }
  0x47   :  { %p539_p6 = scmp.ne.s32.totalorder %s770_s20, %s538_s10  ;;  %p544_p8 = scmp.lt.s32.totalorder %s538_s10, %s538_s10 }
  0x49   :  { %p545_p9 = por %p544_p8, %p543_p7 }
  0x4b   :  { %p546_p10 = pnand %p545_p9, %p539_p6 }
  0x4d   :  { %549 = shalt.err (!%p546_p10)
}
  0x4e   :  { %336 = dma.vmem_to_hbm [thread:$0]  %s770_s20, 32, %s853_s2, [#allocation4]   ;;  %v216_v42 = vrot.slane %v215_v38, 2  ;;  %v222_v43 = vadd.f32 %v221_v39, %v220_v33 }
  0x4f   :  { %s558_s12 = scalar_lea.vmem %s777_s22, 32  ;;  %p563_p12 = scmp.lt.s32.totalorder %s777_s22, %s777_s22 }
  0x50   :  { %p559_p11 = scmp.ne.s32.totalorder %s777_s22, %s558_s12  ;;  %p564_p13 = scmp.lt.s32.totalorder %s558_s12, %s558_s12 }
  0x52   :  { %p565_p0 = por %p564_p13, %p563_p12 }
  0x54   :  { %p566_p1 = pnand %p565_p0, %p559_p11 }
  0x56   :  { %569 = shalt.err (!%p566_p1)
}
  0x57   :  { %356 = dma.vmem_to_hbm [thread:$0]  %s777_s22, 32, %s855_s4, [#allocation9]   ;;  %v235_v44 = vadd.f32 %v234_v40, %v233_v37  ;;  %v241_v45 = vrot.slane %v240_v41, 4 }
  0x58   :  { %s578_s2 = scalar_lea.vmem %s808_s24, 256  ;;  %p583_p3 = scmp.lt.s32.totalorder %s808_s24, %s808_s24 }
  0x59   :  { %p579_p2 = scmp.ne.s32.totalorder %s808_s24, %s578_s2  ;;  %p584_p4 = scmp.lt.s32.totalorder %s578_s2, %s578_s2 }
  0x5b   :  { %p585_p5 = por %p584_p4, %p583_p3 }
  0x5d   :  { %p586_p6 = pnand %p585_p5, %p579_p2 }
  0x5f   :  { %589 = shalt.err (!%p586_p6)
}
  0x60   :  { %400 = dma.vmem_to_hbm [thread:$0]  %s808_s24, 256, %s859_s8, [#allocation15], %s660_s29, %s660_s29, %s661_s30   ;;  %v217_v46 = vadd.f32 %v216_v42, %v215_v38  ;;  %v223_v47 = vrot.slane %v222_v43, 2  ;;  %v236_v48 = vrot.slane %v235_v44, 2  ;;  %v242_v49 = vadd.f32 %v241_v45, %v240_v41 }
  0x61   :  { %s662_s4 = smov [#allocation11]   ;;  %s663_s0 = smov [#allocation13]  }
  0x62   :  { %v218_v50 = vrot.slane %v217_v46, 1  ;;  %v224_v51 = vadd.f32 %v223_v47, %v222_v43  ;;  %v237_v52 = vadd.f32 %v236_v48, %v235_v44  ;;  %v243_v53 = vrot.slane %v242_v49, 2  ;;  %s363_s8 = sshll.u32 %s662_s4, 4  ;;  %s373_s1 = sshll.u32 %s663_s0, 4  ;;  %s364_s8 = int_to_ptr.vmem [resolvable:$true] %s363_s8  ;;  %s374_s1 = int_to_ptr.vmem [resolvable:$true] %s373_s1 }
  0x63   :  { %s598_s17 = scalar_lea.vmem %s364_s8, 32  ;;  %p603_p8 = scmp.lt.s32.totalorder %s364_s8, %s364_s8 }
  0x64   :  { %v219_v54 = vadd.f32 %v218_v50, %v217_v46  ;;  %v225_v55 = vrot.slane %v224_v51, 1  ;;  %v238_v56 = vrot.slane %v237_v52, 1  ;;  %v244_v57 = vadd.f32 %v243_v53, %v242_v49  ;;  %p599_p7 = scmp.ne.s32.totalorder %s364_s8, %s598_s17  ;;  %p604_p9 = scmp.lt.s32.totalorder %s598_s17, %s598_s17 }
  0x66   :  { %v226_v58 = vadd.f32 %v225_v55, %v224_v51  ;;  %v227_v61 = vmul.f32 0.06666667, %v219_v54  ;;  %v239_v62 = vadd.f32 %v238_v56, %v237_v52  ;;  %v245_v63 = vrot.slane %v244_v57, 1  ;;  %p605_p10 = por %p604_p9, %p603_p8 }
  0x68   :  { %v228_v4 = vmul.f32 0.06666667, %v226_v58  ;;  %v249_v7 = vadd.f32 0.0001, %v227_v61  ;;  %v246_v10 = vadd.f32 %v245_v63, %v244_v57  ;;  %v247_v11 = vmul.f32 0.06666667, %v239_v62  ;;  %p606_p11 = pnand %p605_p10, %p599_p7 }
  0x6a   :  { %v250_v12 = vadd.f32 0.0001, %v228_v4  ;;  %450 = vrsqrt.f32 %v249_v7  ;;  %v248_v13 = vmul.f32 0.06666667, %v246_v10  ;;  %v288_v14 = vadd.f32 0.0001, %v247_v11 }
  0x6b   :  { %vm253_vm1 = vcmp.eq.f32.partialorder %v249_v7, inf  ;;  %v256_v17 = vand.u32 2147483648, %v249_v7  ;;  %vm255_vm2 = vcmp.eq.f32.partialorder %v249_v7, 0.0 }
  0x6c   :  { %452 = vrsqrt.f32 %v250_v12  ;;  %v289_v15 = vadd.f32 0.0001, %v248_v13  ;;  %vm260_vm3 = vcmp.eq.f32.partialorder %v250_v12, inf  ;;  %vm262_vm4 = vcmp.eq.f32.partialorder %v250_v12, 0.0 }
  0x6d   :  { %454 = vrsqrt.f32 %v288_v14  ;;  %v263_v20 = vand.u32 2147483648, %v250_v12  ;;  %vm292_vm5 = vcmp.eq.f32.partialorder %v288_v14, inf  ;;  %v295_v2 = vand.u32 2147483648, %v288_v14 }
  0x6e   :  { %456 = vrsqrt.f32 %v289_v15  ;;  %vm294_vm6 = vcmp.eq.f32.partialorder %v288_v14, 0.0  ;;  %vm299_vm7 = vcmp.eq.f32.partialorder %v289_v15, inf  ;;  %v302_v25 = vand.u32 2147483648, %v289_v15 }
  0x6f   :  { %vm301_vm8 = vcmp.eq.f32.partialorder %v289_v15, 0.0 }
  0x77   :  { %v451_v16 = vpop.eup %450 }
  0x78   :  { %v252_v18 = vmul.f32 %v451_v16, %v249_v7 }
  0x79   :  { %v453_v19 = vpop.eup %452 }
  0x7a   :  { %v455_v0 = vpop.eup %454  ;;  %v254_v21 = vsel %vm253_vm1, %v249_v7, %v252_v18  ;;  %v259_v1 = vmul.f32 %v453_v19, %v250_v12 }
  0x7b   :  { %v257_v5 = vsel %vm255_vm2, %v256_v17, %v254_v21  ;;  %v291_v22 = vmul.f32 %v455_v0, %v288_v14  ;;  %v457_v8 = vpop.eup %456 }
  0x7c   :  { %v261_v23 = vsel %vm260_vm3, %v250_v12, %v259_v1  ;;  %v265_v24 = vsub.f32 1.0, %v257_v5  ;;  %v298_v9 = vmul.f32 %v457_v8, %v289_v15 }
  0x7d   :  { %v264_v26 = vsel %vm262_vm4, %v263_v20, %v261_v23  ;;  %v293_v6 = vsel %vm292_vm5, %v288_v14, %v291_v22 }
  0x7e   :  { %v266_v27 = vsub.f32 1.0, %v264_v26  ;;  %v267_v28 = vmax.f32 %v265_v24, 0.0  ;;  %v296_v29 = vsel %vm294_vm6, %v295_v2, %v293_v6  ;;  %v300_v30 = vsel %vm299_vm7, %v289_v15, %v298_v9 }
  0x7f   :  { %v304_v31 = vsub.f32 1.0, %v296_v29  ;;  %v303_v33 = vsel %vm301_vm8, %v302_v25, %v300_v30 }
  0x80   :  { %v268_v32 = vmax.f32 %v266_v27, 0.0  ;;  %v305_v34 = vsub.f32 1.0, %v303_v33 }
  0x81   :  { %v306_v35 = vmax.f32 %v304_v31, 0.0 }
  0x82   :  { %v271_v3 = vcombine.low %v267_v28, %v268_v32  ;;  %v307_v36 = vmax.f32 %v305_v34, 0.0 }
  0x84   :  { %v278_v37 = vrot.slane %v271_v3, %v747_v59  ;;  %v310_v38 = vcombine.low %v306_v35, %v307_v36 }
  0x86   :  { %v285_v39 = vrot.slane %v278_v37, %v747_v59  ;;  %v317_v40 = vrot.slane %v310_v38, %v747_v59 }
  0x88   :  { %287 = vst.msk [vmem:[#allocation11] sm:$0x3] %vm749_vm0, %v285_v39  ;;  %v324_v41 = vrot.slane %v317_v40, %v747_v59 }
  0x89   :  { %609 = shalt.err (!%p606_p11)
}
  0x8a   :  { %366 = dma.vmem_to_hbm [thread:$0]  %s364_s8, 32, %s856_s5, [#allocation12]   ;;  %326 = vst.msk [vmem:[#allocation13] sm:$0x3] %vm749_vm0, %v324_v41 }
  0x8b   :  { %s618_s20 = scalar_lea.vmem %s374_s1, 32  ;;  %p623_p13 = scmp.lt.s32.totalorder %s374_s1, %s374_s1 }
  0x8c   :  { %p619_p12 = scmp.ne.s32.totalorder %s374_s1, %s618_s20  ;;  %p624_p0 = scmp.lt.s32.totalorder %s618_s20, %s618_s20 }
  0x8e   :  { %p625_p1 = por %p624_p0, %p623_p13 }
  0x90   :  { %p626_p2 = pnand %p625_p1, %p619_p12 }
  0x92   :  { %629 = shalt.err (!%p626_p2)
}
  0x93   :  { %376 = dma.vmem_to_hbm [thread:$0]  %s374_s1, 32, %s857_s6, [#allocation12]  }
  0x94   :  { %642 = dma.done.wait [#allocation4], 32  }
  0x95   :  { %643 = vsyncadd [#allocation4], 4294967264 }
  0x96   :  { %644 = dma.done.wait [#allocation9], 64  }
  0x97   :  { %645 = vsyncadd [#allocation9], 4294967232 }
  0x98   :  { %646 = dma.done.wait [#allocation12], 64  }
  0x99   :  { %647 = vsyncadd [#allocation12], 4294967232 }
  0x9a   :  { %648 = dma.done.wait [#allocation15], 512  }
  0x9b   :  { %649 = vsyncadd [#allocation15], 4294966784 }
  0x9c   :  { %422 = vsyncpa [#allocation3], 1 }
  0x9d   :  { %423 = vsyncpa [#allocation6], 1 }
  0x9e   :  { %424 = vsyncpa [#allocation4], 1 }
  0x9f   :  { %425 = vsyncpa [#allocation9], 1 }
  0xa0   :  { %426 = vsyncpa [#allocation12], 1 }
  0xa1   :  { %427 = vsyncpa [#allocation15], 1 }

</bundles_post_ra>
